<compile_context>
chip_gen: v7x
topology: tpu7x:2x2x1
jax: 0.10.0
libtpu: 0.0.40
codegen_flags: <defaults>
</compile_context>

<pallas_src>
import functools
import math

import jax
import jax.numpy as jnp
from jax.experimental import pallas as pl
from jax.experimental.pallas import tpu as pltpu

_LANE = 128
_HEADROOM_BYTES = 8 * 1024 * 1024


def _round_up(x, m):
    return ((x + m - 1) // m) * m


def _pad2(a, shape):
    pads = tuple((0, s - d) for d, s in zip(a.shape, shape))
    if any(p[1] for p in pads):
        a = jnp.pad(a, pads)
    return a


def _vmem_limit_bytes():
    """Generation-aware scoped-VMEM limit (v5e/v6e: 128 MiB phys, v7x: 64 MiB)."""
    try:
        cap = pltpu.get_tpu_info().vmem_capacity_bytes
    except Exception:
        cap = 64 * 1024 * 1024  # conservative (v7x-sized) fallback
    if cap >= 100 * 1024 * 1024:
        return 100 * 1024 * 1024
    return 48 * 1024 * 1024


def _largest_div_tile(dim, cap):
    """Largest multiple of 128 that divides `dim` and is <= max(cap, 128)."""
    cap = max(_LANE, cap)
    best = _LANE
    t = _LANE
    while t <= min(dim, cap):
        if dim % t == 0:
            best = t
        t += _LANE
    return best


def _choose_adj_tiles(N, fo_p, budget):
    """Pick (row/K tile, col tile, padded N, support-resident flag) for adj@support."""
    if fo_p <= 512:
        tn = fo_p
    elif fo_p % 256 == 0:
        tn = 256
    else:
        tn = 128
    n128 = _round_up(N, _LANE)
    # Keep the whole support row-stripe (double-buffered bf16) resident only if
    # it uses at most half of the streaming budget.
    resident = (2 * n128 * tn * 2) <= budget // 2
    for T in (512, 384, 256, 128):
        n_pad = _round_up(N, T)
        # avoid excessive zero-padding waste (> ~25%) from a big tile
        if T != _LANE and (n_pad - n128) * 4 > n128:
            continue
        # guarantee >= 2 steps across the parallel axes (v7x megacore + pipelining)
        if T != _LANE and (n_pad // T) * (fo_p // tn) < 2:
            continue
        sup_bytes = (2 * n_pad * tn * 2) if resident else (2 * T * tn * 2)
        need = (2 * T * T * 4) + sup_bytes + (2 * T * tn * 4) + (T * tn * 4)
        if need <= budget:
            return T, tn, n_pad, resident
    return _LANE, tn, n128, False


# --------------------------------------------------------------------------
# Generic tiled matmul (used for support = X @ W, and as streamed fallback).
# Inputs may be f32; they are cast to bf16 in-kernel (f32 MXU accumulation).
# --------------------------------------------------------------------------
def _matmul_kernel(a_ref, b_ref, o_ref, acc_ref):
    @pl.when(pl.program_id(2) == 0)
    def _():
        acc_ref[...] = jnp.zeros_like(acc_ref)

    acc_ref[...] += jnp.dot(a_ref[...].astype(jnp.bfloat16),
                            b_ref[...].astype(jnp.bfloat16),
                            preferred_element_type=jnp.float32)

    @pl.when(pl.program_id(2) == pl.num_programs(2) - 1)
    def _():
        o_ref[...] = acc_ref[...].astype(o_ref.dtype)


def _pallas_matmul(a, b, *, out_dtype, tm, tn, tk, vmem_limit):
    M, K = a.shape
    Kb, Nc = b.shape
    assert K == Kb
    assert M % tm == 0 and Nc % tn == 0 and K % tk == 0
    grid = (M // tm, Nc // tn, K // tk)
    return pl.pallas_call(
        _matmul_kernel,
        out_shape=jax.ShapeDtypeStruct((M, Nc), out_dtype),
        grid_spec=pltpu.PrefetchScalarGridSpec(
            num_scalar_prefetch=0,
            grid=grid,
            in_specs=[
                pl.BlockSpec((tm, tk), lambda i, j, k: (i, k)),
                pl.BlockSpec((tk, tn), lambda i, j, k: (k, j)),
            ],
            out_specs=pl.BlockSpec((tm, tn), lambda i, j, k: (i, j)),
            scratch_shapes=[pltpu.VMEM((tm, tn), jnp.float32)],
        ),
        compiler_params=pltpu.CompilerParams(
            dimension_semantics=("parallel", "parallel", "arbitrary"),
            vmem_limit_bytes=vmem_limit,
        ),
    )(a, b)


# --------------------------------------------------------------------------
# Dominant matmul: out = adj @ support with the support row-stripe resident
# in VMEM (never re-streamed per adj row tile). adj streams as f32 and is cast
# to bf16 in-kernel; accumulation is f32.
# --------------------------------------------------------------------------
def _adj_matmul_kernel(adj_ref, sup_ref, o_ref, acc_ref, *, tk):
    k = pl.program_id(2)

    @pl.when(k == 0)
    def _():
        acc_ref[...] = jnp.zeros_like(acc_ref)

    start = pl.multiple_of(k * tk, tk)
    acc_ref[...] += jnp.dot(adj_ref[...].astype(jnp.bfloat16),
                            sup_ref[pl.ds(start, tk), :],
                            preferred_element_type=jnp.float32)

    @pl.when(k == pl.num_programs(2) - 1)
    def _():
        o_ref[...] = acc_ref[...].astype(o_ref.dtype)


def _adj_matmul_resident(adj, support, *, tm, tn, tk, vmem_limit):
    Np, K = adj.shape
    Ks, Fo = support.shape
    assert K == Ks and Np == K
    assert Np % tm == 0 and Fo % tn == 0 and K % tk == 0
    grid = (Np // tm, Fo // tn, K // tk)
    return pl.pallas_call(
        functools.partial(_adj_matmul_kernel, tk=tk),
        out_shape=jax.ShapeDtypeStruct((Np, Fo), jnp.float32),
        grid_spec=pltpu.PrefetchScalarGridSpec(
            num_scalar_prefetch=0,
            grid=grid,
            in_specs=[
                pl.BlockSpec((tm, tk), lambda i, j, k: (i, k)),
                # Whole support row-stripe; block index does not change with
                # i or k, so Pallas keeps it resident (no per-(i,k) re-fetch).
                pl.BlockSpec((Np, tn), lambda i, j, k: (0, j)),
            ],
            out_specs=pl.BlockSpec((tm, tn), lambda i, j, k: (i, j)),
            scratch_shapes=[pltpu.VMEM((tm, tn), jnp.float32)],
        ),
        compiler_params=pltpu.CompilerParams(
            dimension_semantics=("parallel", "parallel", "arbitrary"),
            vmem_limit_bytes=vmem_limit,
        ),
    )(adj, support)


def graph_convolution(x, adj, weight, *, vmem_limit_bytes=None,
                      resident_support=None):
    """output = adj @ (x @ weight); f32 result, bf16 MXU with f32 accumulation."""
    N, f_in = x.shape
    f_in_w, f_out = weight.shape
    assert f_in_w == f_in
    assert adj.shape == (N, N)

    vmem_limit = vmem_limit_bytes if vmem_limit_bytes is not None else _vmem_limit_bytes()
    budget = vmem_limit - _HEADROOM_BYTES

    fi_p = _round_up(f_in, _LANE)
    fo_p = _round_up(f_out, _LANE)

    tm2, tn2, n_pad, resident = _choose_adj_tiles(N, fo_p, budget)
    if resident_support is not None:
        resident = resident_support
    tk2 = tm2

    # ---- matmul 1: support = X @ W  (tiny; bf16 MXU, bf16 output) ----------
    x_p = _pad2(x, (n_pad, fi_p)).astype(jnp.float32)
    w_p = _pad2(weight, (fi_p, fo_p)).astype(jnp.float32)
    tm1 = tm2
    tk1 = _largest_div_tile(fi_p, 512)
    tn1 = tn2
    support = _pallas_matmul(x_p, w_p, out_dtype=jnp.bfloat16,
                             tm=tm1, tn=tn1, tk=tk1, vmem_limit=vmem_limit)

    # ---- matmul 2: out = adj @ support  (dominant; adj streamed f32,
    #      cast to bf16 inside the kernel, f32 accumulation) -----------------
    # No external cast pass: when N is already tile-aligned this is a no-op
    # and adj is read exactly once from HBM by the kernel.
    # TODO(synk): in a multi-layer model, keep adj stored persistently as bf16
    # (or int8 for 0/1 adjacency on v5e/v6e) in HBM to halve this stream.
    adj_p = _pad2(adj, (n_pad, n_pad)).astype(jnp.float32)
    if resident:
        out_p = _adj_matmul_resident(adj_p, support, tm=tm2, tn=tn2, tk=tk2,
                                     vmem_limit=vmem_limit)
    else:
        out_p = _pallas_matmul(adj_p, support, out_dtype=jnp.float32,
                               tm=tm2, tn=tn2, tk=tk2, vmem_limit=vmem_limit)

    return out_p[:N, :f_out]


if __name__ == "__main__":
    # Small shapes consistent with the module: N graph nodes, in/out features.
    # Non-multiple-of-128 feature dims exercise the padding path.
    N, in_features, out_features = 512, 96, 80

    key = jax.random.PRNGKey(0)
    k_x, k_adj, k_w, k_b = jax.random.split(key, 4)

    # reset_parameters(): uniform(-stdv, stdv) with stdv = 1/sqrt(out_features).
    stdv = 1.0 / math.sqrt(out_features)
    weight = jax.random.uniform(k_w, (in_features, out_features), jnp.float32,
                                minval=-stdv, maxval=stdv)
    bias = jax.random.uniform(k_b, (out_features,), jnp.float32,
                              minval=-stdv, maxval=stdv)  # parity only; unused in forward

    x = jax.random.normal(k_x, (N, in_features), jnp.float32)
    adj = jax.random.normal(k_adj, (N, N), jnp.float32)

    ref = adj @ (x @ weight)

    # Default configuration: support row-stripe resident in VMEM.
    out = jax.block_until_ready(graph_convolution(x, adj, weight))
    assert out.shape == (N, out_features)

    # Streamed-support fallback path (used automatically for very large graphs).
    out_stream = jax.block_until_ready(
        graph_convolution(x, adj, weight, resident_support=False))
    assert out_stream.shape == (N, out_features)

    # bf16 MXU streaming of adj/support (with f32 accumulation) -> bf16-level
    # relative tolerance against the f32 reference.
    scale = float(jnp.max(jnp.abs(ref)))
    assert float(jnp.max(jnp.abs(out - ref))) < 2e-2 * scale, "mismatch vs reference"
    assert float(jnp.max(jnp.abs(out_stream - ref))) < 2e-2 * scale, "mismatch (streamed support)"

    print("KERNEL_OK")
</pallas_src>

<mosaic_0001>
module attributes {stable_mosaic.version = 11 : i64} {
  func.func @_matmul_kernel(%arg0: i32, %arg1: i32, %arg2: i32, %arg3: memref<256x128xf32, #tpu.memory_space<vmem>>, %arg4: memref<128x128xf32, #tpu.memory_space<vmem>>, %arg5: memref<256x128xbf16, #tpu.memory_space<vmem>>, %arg6: memref<256x128xf32, #tpu.memory_space<vmem>>) attributes {dimension_semantics = [#tpu.dimension_semantics<parallel>, #tpu.dimension_semantics<parallel>, #tpu.dimension_semantics<arbitrary>], iteration_bounds = array<i64: 2, 1, 1>, scalar_prefetch = 0 : i64, scratch_operands = 1 : i64, tpu.core_type = #tpu.core_type<tc>, window_params = [{transform_indices = @transform_0, window_bounds = array<i64: 256, 128>}, {transform_indices = @transform_1, window_bounds = array<i64: 128, 128>}, {transform_indices = @transform_2, window_bounds = array<i64: 256, 128>}]} {
    %c0_i32 = arith.constant 0 : i32
    %0 = arith.cmpi eq, %arg2, %c0_i32 : i32
    %1 = arith.extui %0 : i1 to i32
    %c0_i32_0 = arith.constant 0 : i32
    %2 = arith.cmpi ne, %1, %c0_i32_0 : i32
    scf.if %2 {
      %cst_10 = arith.constant 0.000000e+00 : f32
      %14 = vector.broadcast %cst_10 : f32 to vector<256x128xf32>
      %c0_11 = arith.constant 0 : index
      %c0_12 = arith.constant 0 : index
      %15 = vector.load %arg6[%c0_11, %c0_12] : memref<256x128xf32, #tpu.memory_space<vmem>>, vector<256x128xf32>
      tpu.vector_store %arg6[%c0_11, %c0_12], %14 {strides = array<i32>} : memref<256x128xf32, #tpu.memory_space<vmem>>, vector<256x128xf32>,
    } else {
    }
    %c0 = arith.constant 0 : index
    %c0_1 = arith.constant 0 : index
    %3 = vector.load %arg6[%c0, %c0_1] : memref<256x128xf32, #tpu.memory_space<vmem>>, vector<256x128xf32>
    %c0_2 = arith.constant 0 : index
    %c0_3 = arith.constant 0 : index
    %4 = vector.load %arg3[%c0_2, %c0_3] : memref<256x128xf32, #tpu.memory_space<vmem>>, vector<256x128xf32>
    %5 = arith.truncf %4 : vector<256x128xf32> to vector<256x128xbf16>
    %c0_4 = arith.constant 0 : index
    %c0_5 = arith.constant 0 : index
    %6 = vector.load %arg4[%c0_4, %c0_5] : memref<128x128xf32, #tpu.memory_space<vmem>>, vector<128x128xf32>
    %7 = arith.truncf %6 : vector<128x128xf32> to vector<128x128xbf16>
    %cst = arith.constant dense<0.000000e+00> : vector<256x128xf32>
    %8 = tpu.matmul %5, %7, %cst {dimension_numbers = #tpu.dot_dimension_numbers<[1], [0], [0], [1], [0, 0, 1, 1], [], []>} : vector<256x128xbf16>, vector<128x128xbf16>, vector<256x128xf32> -> vector<256x128xf32>
    %9 = arith.addf %3, %8 : vector<256x128xf32>
    %c0_6 = arith.constant 0 : index
    %c0_7 = arith.constant 0 : index
    %10 = vector.load %arg6[%c0_6, %c0_7] : memref<256x128xf32, #tpu.memory_space<vmem>>, vector<256x128xf32>
    tpu.vector_store %arg6[%c0_6, %c0_7], %9 {strides = array<i32>} : memref<256x128xf32, #tpu.memory_space<vmem>>, vector<256x128xf32>,
    %c0_i32_8 = arith.constant 0 : i32
    %11 = arith.cmpi eq, %arg2, %c0_i32_8 : i32
    %12 = arith.extui %11 : i1 to i32
    %c0_i32_9 = arith.constant 0 : i32
    %13 = arith.cmpi ne, %12, %c0_i32_9 : i32
    scf.if %13 {
      %c0_10 = arith.constant 0 : index
      %c0_11 = arith.constant 0 : index
      %14 = vector.load %arg6[%c0_10, %c0_11] : memref<256x128xf32, #tpu.memory_space<vmem>>, vector<256x128xf32>
      %15 = arith.truncf %14 : vector<256x128xf32> to vector<256x128xbf16>
      %c0_12 = arith.constant 0 : index
      %c0_13 = arith.constant 0 : index
      %16 = vector.load %arg5[%c0_12, %c0_13] : memref<256x128xbf16, #tpu.memory_space<vmem>>, vector<256x128xbf16>
      tpu.vector_store %arg5[%c0_12, %c0_13], %15 {strides = array<i32>} : memref<256x128xbf16, #tpu.memory_space<vmem>>, vector<256x128xbf16>,
    } else {
    }
    return
  }
  func.func @transform_0(%arg0: i32, %arg1: i32, %arg2: i32) -> (i32, i32) {
    %c0_i32 = arith.constant 0 : i32
    return %arg0, %arg2 : i32, i32
  }
  func.func @transform_1(%arg0: i32, %arg1: i32, %arg2: i32) -> (i32, i32) {
    %c0_i32 = arith.constant 0 : i32
    return %arg2, %arg1 : i32, i32
  }
  func.func @transform_2(%arg0: i32, %arg1: i32, %arg2: i32) -> (i32, i32) {
    %c0_i32 = arith.constant 0 : i32
    return %arg0, %arg1 : i32, i32
  }
}

</mosaic_0001>

<bundles_post_ra>
// kernel: tpu_custom_call.1
= control target key start
LH: loop header
LB: loop body
LE: loop exit
PB: predicated region body
PF: predicated region fallthrough
CT: control target
= control target key end

     0   :  { %7 = vsyncpa [#allocation4], 0  ;;  %s1683_s0 = inlined_call_operand.hbm [shape: f32[512,128], index: 0, kind: input, shape index: {}]   ;;  %s1684_s1 = inlined_call_operand.hbm [shape: f32[128,128], index: 1, kind: input, shape index: {}]   ;;  %s1685_s2 = inlined_call_operand.hbm [shape: bf16[512,128], index: 2, kind: output, shape index: {}]  }
   0x1   :  { %9 = vsyncpa [#allocation4 + $0x1], 0 }
   0x2   :  { %10 = vsyncpa [#allocation7], 0 }
   0x3   :  { %11 = vsyncpa [#allocation5], 0 }
   0x4   :  { %13 = vsyncpa [#allocation5 + $0x1], 0  ;;  %s1404_s9 = smov 0   ;;  %s1406_s10 = smov 0  }
   0x5   :  { %s1408_s11 = smov 0   ;;  %s1410_s12 = smov 0  }
   0x6   :  { %s1412_s13 = smov 0   ;;  %s1414_s14 = smov 0  }
   0x7 LB: > { %s893_s15 = sadd.s32 4294967295, %s1380_s14   ;;  %s894_s16 = sadd.s32 4294967294, %s1380_s14   ;;  %s1380_s14 = sphi %s1414_s14, %s19_s14   ;;  %s1376_s13 = sphi %s1412_s13, %s1709_s13   ;;  %s1372_s12 = sphi %s1410_s12, %s1708_s12   ;;  %s1368_s11 = sphi %s1408_s11, %s1707_s11   ;;  %s1364_s10 = sphi %s1406_s10, %s1706_s10   ;;  %s1360_s9 = sphi %s1404_s9, %s1705_s9  }
   0x8   : > { %p60_p0 = scmp.ne.s32.totalorder %s1364_s10, %s1360_s9  ;;  %p1438_p1 = scmp.eq.s32.totalorder %s893_s15, 0 }
   0x9   : > { %p1442_p2 = scmp.eq.s32.totalorder %s893_s15, 1  ;;  %p120_p3 = scmp.eq.s32.totalorder %s894_s16, 1 }
   0xa   : > { %s1690_s17 = scalar_select %p1438_p1, 1, 0 }
   0xb   : > { %s1691_s18 = scalar_select %p1442_p2, 1, 0 }
   0xc   : > { %p1448_p4 = por %p1438_p1, %p60_p0  ;;  %p895_p5 = scmp.ge.s32.totalorder %s1380_s14, 1 }
   0xd   : > { %p1453_p6 = por %p120_p3, %p60_p0  ;;  %p127_p7 = scmp.lt.s32.totalorder %s1380_s14, 3 }
   0xe   : > { %s1692_s19 = scalar_select %p1448_p4, 1, 0 }
   0xf   : > { %s1693_s20 = scalar_select %p1453_p6, 1, 0 }
  0x10   : > { %p1458_p8 = pnand %p895_p5, %p127_p7  ;;  %s1382_s22 = smov [#allocation6]  }
  0x11   : > { %s143_s23 = sshll.u32 %s1382_s22, 4  ;;  %s38_s25 = sadd.s32 1, %s1376_s13  ;;  %s144_s23 = int_to_ptr.vmem [resolvable:$true] %s143_s23 }
  0x12   : > { %s1694_s21 = scalar_select %p1458_p8, 1, 0 }
  0x13   : > { %p1167_p9 = pneg %p1458_p8  ;;  %s1236_s28 = scalar_lea.hbm %s1684_s1, 2048 }
  0x14   : > { %p1237_p12 = scmp.ne.s32.totalorder %s1684_s1, %s1236_s28  ;;  %p1243_p5 = scmp.lt.u32.totalorder %s1236_s28, %s1684_s1 }
  0x15   : > { %p1467_p11 = pnand %p1167_p9, %p1438_p1 }
  0x17   : > { %p1238_p13 = pneg %p1467_p11 }
  0x19   : > { %p1239_p0 = pnand %p1238_p13, %p1237_p12 }
  0x1b   : > { %p1240_p3 = pneg %p1239_p0 }
  0x1d   : > { %p1245_p7 = pnand %p1243_p5, %p1240_p3 }
  0x1f   : > { %1248 = shalt.err (!%p1245_p7)
}
  0x20   : > { %s1249_s5 = scalar_lea.vmem %s144_s23, 2048  ;;  %p1257_p1 = scmp.lt.s32.totalorder %s144_s23, %s144_s23 }
  0x21   : > { %p1250_p9 = scmp.ne.s32.totalorder %s144_s23, %s1249_s5  ;;  %p1258_p4 = scmp.lt.s32.totalorder %s1249_s5, %s1249_s5 }
  0x23   : > { %p1252_p10 = pnand %p1250_p9, %p1238_p13  ;;  %p1259_p8 = por %p1258_p4, %p1257_p1 }
  0x25   : > { %p1253_p6 = pneg %p1252_p10 }
  0x27   : > { %p1260_p2 = pnand %p1259_p8, %p1253_p6 }
  0x29   : > { %1263 = shalt.err (!%p1260_p2)
}
  0x2a   : > { %s1383_s6 = smov 128   ;;  %s1384_s7 = smov 8  }
  0x2b   : > { %1170 = dma.hbm_to_vmem [thread:$0]  (!%p1467_p11), %s1684_s1, 2048, %s144_s23, [#allocation7], %s1383_s6, %s1383_s6, %s1384_s7  }
  0x2c   : > { %p40_p1 = scmp.ge.s32.totalorder %s38_s25, 2  ;;  %s47_s16 = sadd.s32 1, %s1368_s11 }
  0x2d   : > { %p54_p2 = scmp.ne.s32.totalorder %s1368_s11, %s1364_s10  ;;  %p55_p4 = scmp.eq.s32.totalorder %s1380_s14, 0 }
  0x2e   : > { %s1711_s25 = smov (%p40_p1, %s38_s25), 0  ;;  %p1697_p8 = scmp.ne.s32.totalorder %s1691_s18, 0 }
  0x2f   : > { %p1497_p6 = por %p55_p4, %p54_p2  ;;  %s42_s26 = ssub.s32 %s1376_s13, %s1711_s25 }
  0x30   : > { %p1503_p10 = por %p1697_p8, %p54_p2  ;;  %p1180_p12 = scmp.lt.s32.totalorder %s1380_s14, 2 }
  0x31   : > { %p45_p11 = scmp.eq.s32.totalorder %s42_s26, 0  ;;  %s157_s23 = sand.u32 1, %s1368_s11  }
  0x32   : > { %s898_s27 = sshll.u32 %s157_s23, 8  ;;  %s942_s29 = sshll.u32 %s1376_s13, 12 }
  0x33   : > { %s1512_s28 = scalar_select %p45_p11, %s1368_s11, %s47_s16  }
  0x34   : > { %s1518_s4 = scalar_lea.hbm %s1683_s0, %s942_s29  ;;  %s161_s18 = scalar_lea.vmem [#allocation3], %s898_s27 }
  0x35   : > { %s169_s5 = sshll.u32 %s161_s18, 4  ;;  %p1524_p13 = pnand %p1180_p12, %p1497_p6  ;;  %s1520_s5 = int_to_ptr.vmem [resolvable:$true] %s169_s5 }
  0x36   : > { %s1528_s15 = scalar_lea.sflag [#allocation4], %s157_s23  ;;  %s1264_s16 = scalar_lea.hbm %s1518_s4, 4096 }
  0x37   : > { %p1265_p0 = scmp.ne.s32.totalorder %s1518_s4, %s1264_s16  ;;  %p1266_p3 = pneg %p1524_p13 }
  0x38   : > { %s1269_s22 = scalar_lea.hbm %s1683_s0, 8192  ;;  %p1270_p9 = scmp.lt.u32.totalorder %s1518_s4, %s1683_s0 }
  0x39   : > { %p1267_p5 = pnand %p1266_p3, %p1265_p0  ;;  %p1271_p1 = scmp.lt.u32.totalorder %s1269_s22, %s1264_s16 }
  0x3a   : > { %p1273_p4 = scmp.lt.u32.totalorder %s1264_s16, %s1518_s4 }
  0x3b   : > { %p1268_p7 = pneg %p1267_p5  ;;  %p1272_p2 = por %p1271_p1, %p1270_p9 }
  0x3d   : > { %p1274_p6 = por %p1273_p4, %p1272_p2 }
  0x3f   : > { %p1275_p8 = pnand %p1274_p6, %p1268_p7 }
  0x41   : > { %1278 = shalt.err (!%p1275_p8)
}
  0x42   : > { %s1279_s23 = scalar_lea.vmem %s1520_s5, 4096  ;;  %s1385_s3 = smov [#allocation3]  }
  0x43   : > { %p1280_p12 = scmp.ne.s32.totalorder %s1520_s5, %s1279_s23  ;;  %s1284_s18 = sshll.u32 %s1385_s3, 4  ;;  %s1285_s18 = int_to_ptr.vmem [resolvable:$false] %s1284_s18 }
  0x44   : > { %s1286_s26 = scalar_lea.vmem %s1285_s18, 8192  ;;  %p1287_p5 = scmp.lt.s32.totalorder %s1520_s5, %s1285_s18 }
  0x45   : > { %p1282_p11 = pnand %p1280_p12, %p1266_p3  ;;  %p1288_p9 = scmp.lt.s32.totalorder %s1286_s26, %s1279_s23 }
  0x47   : > { %p1283_p0 = pneg %p1282_p11  ;;  %p1289_p1 = por %p1288_p9, %p1287_p5 }
  0x49   : > { %p1290_p2 = pnand %p1289_p1, %p1283_p0 }
  0x4b   : > { %1293 = shalt.err (!%p1290_p2)
}
  0x4c   : > { %1174 = dma.hbm_to_vmem [thread:$0]  (!%p1524_p13), %s1518_s4, 4096, %s1520_s5, %s1528_s15, %s1383_s6, %s1383_s6, %s1384_s7  }
  0x4d   : > { %p1700_p3 = scmp.ne.s32.totalorder %s1694_s21, 0 }
  0x4e   : > { %s1562_s16 = sand.u32 (!%p1700_p3), 1, %s1364_s10   ;;  %p1701_p7 = scmp.ne.s32.totalorder (!%p1700_p3), %s1692_s19, 0 }
  0x4f   : > { %181 = sbr.rel (%p1700_p3) target bundleno = 381 (0x17d), region = 28  ;;  %s902_s27 = sshll.u32 (!%p1700_p3), %s1562_s16, 8 }
  0x50   : > { %s184_s22 = scalar_lea.sflag (!%p1700_p3), [#allocation4], %s1562_s16  ;;  %s1566_s29 = scalar_lea.vmem (!%p1700_p3), [#allocation3], %s902_s27 }
  0x56   : > { %1347 = dma.done.wait (%p1701_p7), %s184_s22, 4096  }
  0x57   : > { %1349 = vsyncadd (%p1701_p7), %s184_s22, 4294963200  ;;  %p1702_p13 = scmp.ne.s32.totalorder %s1690_s17, 0 }
  0x59   : > { %1351 = dma.done.wait (%p1702_p13), [#allocation7], 2048  }
  0x5a   : > { %1353 = vsyncadd (%p1702_p13), [#allocation7], 4294965248  ;;  %v332_v0 = vld [vmem:[#allocation6] sm:$0xff]  ;;  %v333_v1 = vld [vmem:[#allocation6 + $0x8] sm:$0xff]  ;;  %s904_s17 = sshll.u32 %s1562_s16, 7  ;;  %s975_s21 = sshll.u32 %s1372_s12, 11 }
  0x5b   : > { %v334_v2 = vld [vmem:[#allocation6 + $0x10] sm:$0xff]  ;;  %v348_v3 = vpack.c.bf16 %v333_v1, %v332_v0  ;;  %v335_v4 = vld [vmem:[#allocation6 + $0x18] sm:$0xff]  ;;  %v336_v6 = vld [vmem:[#allocation6 + $0x20] sm:$0xff]  ;;  %s1609_s19 = scalar_lea.vmem [#allocation8], %s904_s17  ;;  %s1628_s5 = scalar_lea.hbm %s1685_s2, %s975_s21 }
  0x5c   : > { %v349_v5 = vpack.c.bf16 %v335_v4, %v334_v2  ;;  %v337_v7 = vld [vmem:[#allocation6 + $0x28] sm:$0xff]  ;;  %v338_v9 = vld [vmem:[#allocation6 + $0x30] sm:$0xff]  ;;  %v284_v10 = vld [vmem:[%s1566_s29] sm:$0xff]  ;;  %s791_s6 = sshll.u32 %s1609_s19, 4  ;;  %s777_s12 = scalar_lea.sflag [#allocation5], %s1562_s16  ;;  %s1630_s6 = int_to_ptr.vmem [resolvable:$true] %s791_s6 }
  0x5d   : > { %1095 = vmatprep.subr.bf16.mxu0 %v348_v3  ;;  %1143 = vmatprep.subr.bf16.mxu1 %v348_v3  ;;  %v350_v8 = vpack.c.bf16 %v337_v7, %v336_v6  ;;  %v285_v11 = vld [vmem:[%s1566_s29 + $0x8] sm:$0xff]  ;;  %v339_v12 = vld [vmem:[#allocation6 + $0x38] sm:$0xff]  ;;  %v300_v14 = vld [vmem:[%s1566_s29 + $0x80] sm:$0xff]  ;;  %s1294_s8 = scalar_lea.vmem %s1630_s6, 2048  ;;  %s1386_s15 = smov [#allocation8]  }
  0x5e   : > { %1096 = vmatpush3.bf16.msra.mxu0 %v348_v3  ;;  %1151 = vmatpush3.bf16.msra.mxu1 %v348_v3  ;;  %v316_v13 = vpack.c.bf16 %v285_v11, %v284_v10  ;;  %v301_v15 = vld [vmem:[%s1566_s29 + $0x88] sm:$0xff]  ;;  %v351_v17 = vpack.c.bf16 %v339_v12, %v338_v9  ;;  %v340_v18 = vld [vmem:[#allocation6 + $0x40] sm:$0xff]  ;;  %v342_v21 = vld [vmem:[#allocation6 + $0x50] sm:$0xff]  ;;  %p1295_p4 = scmp.ne.s32.totalorder %s1630_s6, %s1294_s8  ;;  %s1298_s30 = sshll.u32 %s1386_s15, 4  ;;  %s1299_s30 = int_to_ptr.vmem [resolvable:$false] %s1298_s30 }
  0x5f   : > { %1097 = vmatprep.subr.bf16.mxu0 %v349_v5  ;;  %1144 = vmatprep.subr.bf16.mxu1 %v349_v5  ;;  %v324_v16 = vpack.c.bf16 %v301_v15, %v300_v14  ;;  %v341_v19 = vld [vmem:[#allocation6 + $0x48] sm:$0xff]  ;;  %v343_v22 = vld [vmem:[#allocation6 + $0x58] sm:$0xff]  ;;  %v344_v24 = vld [vmem:[#allocation6 + $0x60] sm:$0xff]  ;;  %s1300_s23 = scalar_lea.vmem %s1299_s30, 4096  ;;  %p1301_p12 = scmp.lt.s32.totalorder %s1630_s6, %s1299_s30 }
  0x60   : > { %1111 = vmatprep.mubr.bf16.mxu0 %v316_v13  ;;  %v352_v20 = vpack.c.bf16 %v341_v19, %v340_v18  ;;  %v353_v23 = vpack.c.bf16 %v343_v22, %v342_v21  ;;  %v345_v25 = vld [vmem:[#allocation6 + $0x68] sm:$0xff]  ;;  %v346_v27 = vld [vmem:[#allocation6 + $0x70] sm:$0xff]  ;;  %v347_v28 = vld [vmem:[#allocation6 + $0x78] sm:$0xff]  ;;  %p1296_p6 = pnand %p1295_p4, %p1503_p10  ;;  %p1302_p11 = scmp.lt.s32.totalorder %s1300_s23, %s1294_s8 }
  0x61   : > { %1127 = vmatprep.mubr.bf16.mxu1 %v324_v16  ;;  %v354_v26 = vpack.c.bf16 %v345_v25, %v344_v24  ;;  %v355_v29 = vpack.c.bf16 %v347_v28, %v346_v27  ;;  %v286_v30 = vld [vmem:[%s1566_s29 + $0x10] sm:$0xff]  ;;  %v287_v31 = vld [vmem:[%s1566_s29 + $0x18] sm:$0xff]  ;;  %v288_v34 = vld [vmem:[%s1566_s29 + $0x20] sm:$0xff] }
  0x62   : > { %1098 = vmatpush3.bf16.msra.mxu0 %v349_v5  ;;  %1152 = vmatpush3.bf16.msra.mxu1 %v349_v5  ;;  %v302_v32 = vld [vmem:[%s1566_s29 + $0x90] sm:$0xff]  ;;  %v303_v33 = vld [vmem:[%s1566_s29 + $0x98] sm:$0xff]  ;;  %v289_v35 = vld [vmem:[%s1566_s29 + $0x28] sm:$0xff]  ;;  %v317_v38 = vpack.c.bf16 %v287_v31, %v286_v30  ;;  %p1297_p8 = pneg %p1296_p6  ;;  %p1303_p0 = por %p1302_p11, %p1301_p12 }
  0x63   : > { %1099 = vmatprep.subr.bf16.mxu0 %v350_v8  ;;  %1145 = vmatprep.subr.bf16.mxu1 %v350_v8  ;;  %v304_v36 = vld [vmem:[%s1566_s29 + $0xa0] sm:$0xff]  ;;  %v305_v37 = vld [vmem:[%s1566_s29 + $0xa8] sm:$0xff]  ;;  %v325_v39 = vpack.c.bf16 %v303_v33, %v302_v32  ;;  %v318_v40 = vpack.c.bf16 %v289_v35, %v288_v34  ;;  %v290_v42 = vld [vmem:[%s1566_s29 + $0x30] sm:$0xff] }
  0x64   : > { %v326_v41 = vpack.c.bf16 %v305_v37, %v304_v36  ;;  %v291_v43 = vld [vmem:[%s1566_s29 + $0x38] sm:$0xff]  ;;  %v306_v44 = vld [vmem:[%s1566_s29 + $0xb0] sm:$0xff]  ;;  %v292_v46 = vld [vmem:[%s1566_s29 + $0x40] sm:$0xff]  ;;  %p1304_p5 = pnand %p1303_p0, %p1297_p8 }
  0x65   : > { %v307_v45 = vld [vmem:[%s1566_s29 + $0xb8] sm:$0xff]  ;;  %v293_v47 = vld [vmem:[%s1566_s29 + $0x48] sm:$0xff]  ;;  %v308_v48 = vld [vmem:[%s1566_s29 + $0xc0] sm:$0xff]  ;;  %v319_v50 = vpack.c.bf16 %v291_v43, %v290_v42 }
  0x66   : > { %1100 = vmatpush3.bf16.msra.mxu0 %v350_v8  ;;  %1153 = vmatpush3.bf16.msra.mxu1 %v350_v8  ;;  %v309_v49 = vld [vmem:[%s1566_s29 + $0xc8] sm:$0xff]  ;;  %v327_v51 = vpack.c.bf16 %v307_v45, %v306_v44  ;;  %v320_v52 = vpack.c.bf16 %v293_v47, %v292_v46  ;;  %v294_v54 = vld [vmem:[%s1566_s29 + $0x50] sm:$0xff]  ;;  %v295_v55 = vld [vmem:[%s1566_s29 + $0x58] sm:$0xff] }
  0x67   : > { %1101 = vmatprep.subr.bf16.mxu0 %v351_v17  ;;  %1146 = vmatprep.subr.bf16.mxu1 %v351_v17  ;;  %v328_v53 = vpack.c.bf16 %v309_v49, %v308_v48  ;;  %v310_v56 = vld [vmem:[%s1566_s29 + $0xd0] sm:$0xff]  ;;  %v311_v57 = vld [vmem:[%s1566_s29 + $0xd8] sm:$0xff]  ;;  %v296_v58 = vld [vmem:[%s1566_s29 + $0x60] sm:$0xff]  ;;  %v321_v62 = vpack.c.bf16 %v295_v55, %v294_v54 }
  0x68   : > { %v297_v59 = vld [vmem:[%s1566_s29 + $0x68] sm:$0xff]  ;;  %v312_v60 = vld [vmem:[%s1566_s29 + $0xe0] sm:$0xff]  ;;  %v329_v63 = vpack.c.bf16 %v311_v57, %v310_v56  ;;  %v298_v2 = vld [vmem:[%s1566_s29 + $0x70] sm:$0xff] }
  0x69   : > { %v313_v61 = vld [vmem:[%s1566_s29 + $0xe8] sm:$0xff]  ;;  %v322_v0 = vpack.c.bf16 %v297_v59, %v296_v58  ;;  %v299_v3 = vld [vmem:[%s1566_s29 + $0x78] sm:$0xff]  ;;  %v314_v4 = vld [vmem:[%s1566_s29 + $0xf0] sm:$0xff] }
  0x6a   : > { %1102 = vmatpush3.bf16.msra.mxu0 %v351_v17  ;;  %1154 = vmatpush3.bf16.msra.mxu1 %v351_v17  ;;  %v330_v1 = vpack.c.bf16 %v313_v61, %v312_v60  ;;  %v315_v5 = vld [vmem:[%s1566_s29 + $0xf8] sm:$0xff]  ;;  %v323_v6 = vpack.c.bf16 %v299_v3, %v298_v2 }
  0x6b   : > { %1103 = vmatprep.subr.bf16.mxu0 %v352_v20  ;;  %1147 = vmatprep.subr.bf16.mxu1 %v352_v20  ;;  %v331_v7 = vpack.c.bf16 %v315_v5, %v314_v4 }
  0x6e   : > { %1104 = vmatpush3.bf16.msra.mxu0 %v352_v20  ;;  %1155 = vmatpush3.bf16.msra.mxu1 %v352_v20 }
  0x6f   : > { %1105 = vmatprep.subr.bf16.mxu0 %v353_v23  ;;  %1148 = vmatprep.subr.bf16.mxu1 %v353_v23 }
  0x72   : > { %1106 = vmatpush3.bf16.msra.mxu0 %v353_v23  ;;  %1156 = vmatpush3.bf16.msra.mxu1 %v353_v23 }
  0x73   : > { %1107 = vmatprep.subr.bf16.mxu0 %v354_v26  ;;  %1149 = vmatprep.subr.bf16.mxu1 %v354_v26 }
  0x76   : > { %1108 = vmatpush3.bf16.msra.mxu0 %v354_v26  ;;  %1157 = vmatpush3.bf16.msra.mxu1 %v354_v26 }
  0x77   : > { %1109 = vmatprep.subr.bf16.mxu0 %v355_v29  ;;  %1150 = vmatprep.subr.bf16.mxu1 %v355_v29 }
  0x7a   : > { %1110 = vmatpush3.bf16.msra.mxu0 %v355_v29  ;;  %1158 = vmatpush3.bf16.msra.mxu1 %v355_v29 }
  0x7d   : > { %1112 = vmatmul.mubr.bf16.vlgmr.msra.gmra.mrb[0].mxu0 %v317_v38  ;;  %1128 = vmatmul.mubr.bf16.vlgmr.msra.gmra.mrb[0].mxu1 %v325_v39 }
  0x7e   : > { %1115 = vmatprep.mubr.bf16.mxu0 %v318_v40  ;;  %1131 = vmatprep.mubr.bf16.mxu1 %v326_v41 }
  0x85   : > { %1116 = vmatmul.mubr.bf16.gmra.mrb[4].mxu0 %v319_v50  ;;  %1132 = vmatmul.mubr.bf16.gmra.mrb[4].mxu1 %v327_v51 }
  0x86   : > { %1119 = vmatprep.mubr.bf16.mxu0 %v320_v52  ;;  %1135 = vmatprep.mubr.bf16.mxu1 %v328_v53 }
  0x8d   : > { %1120 = vmatmul.mubr.bf16.gmra.mrb[8].mxu0 %v321_v62  ;;  %1136 = vmatmul.mubr.bf16.gmra.mrb[8].mxu1 %v329_v63 }
  0x8e   : > { %1123 = vmatprep.mubr.bf16.mxu0 %v322_v0  ;;  %1139 = vmatprep.mubr.bf16.mxu1 %v330_v1 }
  0x95   : > { %1124 = vmatmul.mubr.bf16.gmra.mrb[12].mxu0 %v323_v6  ;;  %1140 = vmatmul.mubr.bf16.gmra.mrb[12].mxu1 %v331_v7 }
 0x150   : > { %v1113_v8 = vpop.f32.mrb[0].mxu0  ;;  %v1129_v9 = vpop.f32.mrb[0].mxu1 }
 0x151   : > { %v390_v10 = vpop.f32.mrb[1].mxu0  ;;  %v454_v11 = vpop.f32.mrb[1].mxu1 }
 0x152   : > { %v1114_v12 = vpop.f32.mrb[2].mxu0  ;;  %v1130_v13 = vpop.f32.mrb[2].mxu1 }
 0x153   : > { %v984_v14 = vpack.c.bf16 %v1114_v12, %v1113_v8  ;;  %v1024_v15 = vpack.c.bf16 %v1130_v13, %v1129_v9  ;;  %v393_v16 = vpop.f32.mrb[3].mxu0  ;;  %v457_v17 = vpop.f32.mrb[3].mxu1 }
 0x154   : > { %v979_v18 = vpack.c.bf16 %v393_v16, %v390_v10  ;;  %v1019_v19 = vpack.c.bf16 %v457_v17, %v454_v11 }
 0x155   : > { %1056 = vst [vmem:[%s1609_s19 + $0x8] sm:$0xff] %v984_v14   ;;  %1064 = vst [vmem:[%s1609_s19 + $0x48] sm:$0xff] %v1024_v15  }
 0x156   : > { %980 = vst [vmem:[%s1609_s19] sm:$0xff] %v979_v18   ;;  %1063 = vst [vmem:[%s1609_s19 + $0x40] sm:$0xff] %v1019_v19  }
 0x158   : > { %v1117_v20 = vpop.f32.mrb[4].mxu0  ;;  %v1133_v21 = vpop.f32.mrb[4].mxu1 }
 0x159   : > { %v406_v22 = vpop.f32.mrb[5].mxu0  ;;  %v470_v23 = vpop.f32.mrb[5].mxu1 }
 0x15a   : > { %v1118_v24 = vpop.f32.mrb[6].mxu0  ;;  %v1134_v25 = vpop.f32.mrb[6].mxu1 }
 0x15b   : > { %v994_v26 = vpack.c.bf16 %v1118_v24, %v1117_v20  ;;  %v1034_v27 = vpack.c.bf16 %v1134_v25, %v1133_v21  ;;  %v409_v28 = vpop.f32.mrb[7].mxu0  ;;  %v473_v29 = vpop.f32.mrb[7].mxu1 }
 0x15c   : > { %v989_v30 = vpack.c.bf16 %v409_v28, %v406_v22  ;;  %v1029_v31 = vpack.c.bf16 %v473_v29, %v470_v23 }
 0x15d   : > { %1058 = vst [vmem:[%s1609_s19 + $0x18] sm:$0xff] %v994_v26   ;;  %1066 = vst [vmem:[%s1609_s19 + $0x58] sm:$0xff] %v1034_v27  }
 0x15e   : > { %1057 = vst [vmem:[%s1609_s19 + $0x10] sm:$0xff] %v989_v30   ;;  %1065 = vst [vmem:[%s1609_s19 + $0x50] sm:$0xff] %v1029_v31  }
 0x160   : > { %v1121_v32 = vpop.f32.mrb[8].mxu0  ;;  %v1137_v33 = vpop.f32.mrb[8].mxu1 }
 0x161   : > { %v422_v34 = vpop.f32.mrb[9].mxu0  ;;  %v486_v35 = vpop.f32.mrb[9].mxu1 }
 0x162   : > { %v1122_v36 = vpop.f32.mrb[10].mxu0  ;;  %v1138_v37 = vpop.f32.mrb[10].mxu1 }
 0x163   : > { %v1004_v38 = vpack.c.bf16 %v1122_v36, %v1121_v32  ;;  %v1044_v39 = vpack.c.bf16 %v1138_v37, %v1137_v33  ;;  %v425_v40 = vpop.f32.mrb[11].mxu0  ;;  %v489_v41 = vpop.f32.mrb[11].mxu1 }
 0x164   : > { %v999_v42 = vpack.c.bf16 %v425_v40, %v422_v34  ;;  %v1039_v43 = vpack.c.bf16 %v489_v41, %v486_v35 }
 0x165   : > { %1060 = vst [vmem:[%s1609_s19 + $0x28] sm:$0xff] %v1004_v38   ;;  %1068 = vst [vmem:[%s1609_s19 + $0x68] sm:$0xff] %v1044_v39  }
 0x166   : > { %1059 = vst [vmem:[%s1609_s19 + $0x20] sm:$0xff] %v999_v42   ;;  %1067 = vst [vmem:[%s1609_s19 + $0x60] sm:$0xff] %v1039_v43  }
 0x168   : > { %v1125_v44 = vpop.f32.mrb[12].mxu0  ;;  %v1141_v45 = vpop.f32.mrb[12].mxu1 }
 0x169   : > { %v438_v46 = vpop.f32.mrb[13].mxu0  ;;  %v502_v47 = vpop.f32.mrb[13].mxu1 }
 0x16a   : > { %v1126_v48 = vpop.f32.mrb[14].mxu0  ;;  %v1142_v49 = vpop.f32.mrb[14].mxu1 }
 0x16b   : > { %v1014_v50 = vpack.c.bf16 %v1126_v48, %v1125_v44  ;;  %v1054_v51 = vpack.c.bf16 %v1142_v49, %v1141_v45  ;;  %v441_v52 = vpop.f32.mrb[15].mxu0  ;;  %v505_v53 = vpop.f32.mrb[15].mxu1 }
 0x16c   : > { %v1009_v54 = vpack.c.bf16 %v441_v52, %v438_v46  ;;  %v1049_v55 = vpack.c.bf16 %v505_v53, %v502_v47 }
 0x16d   : > { %1062 = vst [vmem:[%s1609_s19 + $0x38] sm:$0xff] %v1014_v50   ;;  %1070 = vst [vmem:[%s1609_s19 + $0x78] sm:$0xff] %v1054_v51  }
 0x16e   : > { %1061 = vst [vmem:[%s1609_s19 + $0x30] sm:$0xff] %v1009_v54   ;;  %1069 = vst [vmem:[%s1609_s19 + $0x70] sm:$0xff] %v1049_v55  }
 0x16f   : > { %1307 = shalt.err (!%p1304_p5)
}
 0x170   : > { %s1308_s3 = scalar_lea.hbm %s1628_s5, 2048  ;;  %s1312_s27 = scalar_lea.hbm %s1685_s2, 4096 }
 0x171   : > { %p1309_p9 = scmp.ne.s32.totalorder %s1628_s5, %s1308_s3  ;;  %p1313_p3 = scmp.lt.u32.totalorder %s1628_s5, %s1685_s2 }
 0x172   : > { %p1314_p7 = scmp.lt.u32.totalorder %s1312_s27, %s1308_s3  ;;  %p1316_p4 = scmp.lt.u32.totalorder %s1308_s3, %s1628_s5 }
 0x173   : > { %p1310_p1 = pnand %p1309_p9, %p1503_p10 }
 0x174   : > { %p1315_p13 = por %p1314_p7, %p1313_p3 }
 0x175   : > { %p1311_p2 = pneg %p1310_p1 }
 0x176   : > { %p1317_p6 = por %p1316_p4, %p1315_p13 }
 0x178   : > { %p1318_p8 = pnand %p1317_p6, %p1311_p2 }
 0x17a   : > { %1321 = shalt.err (!%p1318_p8)
}
 0x17b   : > { %s1387_s17 = smov 64   ;;  %s1388_s19 = smov 4  }
 0x17c   : > { %1165 = dma.vmem_to_hbm [thread:$0]  (%p1503_p10), %s1630_s6, 2048, %s1628_s5, %s777_s12, %s1387_s17, %s1387_s17, %s1388_s19  }
 0x17d PF: > { %s806_s21 = sand.u32 1, %s1360_s9   ;;  %p1703_p12 = scmp.ne.s32.totalorder %s1693_s20, 0 }
 0x17e   : > { %p1704_p11 = scmp.ge.s32.totalorder %s1380_s14, 2  ;;  %s807_s7 = scalar_lea.sflag [#allocation5], %s806_s21 }
 0x180   : > { %p1176_p0 = pnand %p1704_p11, %p1703_p12 }
 0x182   : > { %1355 = dma.done.wait (!%p1176_p0), %s807_s7, 2048  }
 0x183   : > { %1357 = vsyncadd (!%p1176_p0), %s807_s7, 4294965248  ;;  %s19_s14 = sadd.s32 1, %s1380_s14   ;;  %s1705_s9 = smov %s1364_s10 }
 0x184   : > { %p16_p5 = scmp.ge.s32.totalorder %s19_s14, 4   ;;  %s1706_s10 = smov %s1368_s11 }
 0x185   : > { %s1707_s11 = smov %s1512_s28  ;;  %s1708_s12 = smov %s1376_s13 }
 0x186   : > { %s1709_s13 = smov %s1711_s25  ;;  %18 = sbr.rel (!%p16_p5) target bundleno = 7 (0x7), region = 86 }
 0x18d   :  { %812 = vsyncpa [#allocation4], 1 }
 0x18e   :  { %814 = vsyncpa [#allocation4 + $0x1], 1 }
 0x18f   :  { %815 = vsyncpa [#allocation7], 1 }
 0x190   :  { %816 = vsyncpa [#allocation5], 1 }
 0x191   :  { %818 = vsyncpa [#allocation5 + $0x1], 1 }

</bundles_post_ra>
